<compile_context>
chip_gen: v6e
topology: v6e:2x2x1
jax: 0.10.0
libtpu: 0.0.40
codegen_flags: <defaults>
</compile_context>

<pallas_src>
import functools

import jax
import jax.numpy as jnp
from jax.experimental import pallas as pl
from jax.experimental.pallas import tpu as pltpu

BN_EPS = 1e-5
_LANE = 128
_MAX_TILE_APPLY = 2048          # 2*C_out*tile*4 <= ~16 MiB even at C_out=1024
_MAX_TILE_STATS = 4096
_VMEM_BUDGET_APPLY = 40 * 1024 * 1024   # block-buffer budget, safe on v7x (64 MiB/TC)
_VMEM_BUDGET_STATS = 24 * 1024 * 1024
_VMEM_LIMIT_CAP = 56 * 1024 * 1024      # stay below v7x physical VMEM


def _round_up(x, m):
    return ((x + m - 1) // m) * m


def _pick_tile(l, per_lane_bytes, budget_bytes, max_tile):
    """Largest lane tile (multiple of 128, or full L if L<=128) fitting the budget."""
    if l <= _LANE:
        return l                      # full-extent block (equals array dim -> allowed)
    t = max(_LANE, min(budget_bytes // per_lane_bytes, max_tile, _round_up(l, _LANE)))
    return (t // _LANE) * _LANE


def _vmem_limit(need_bytes):
    return int(min(_VMEM_LIMIT_CAP,
                   max(16 * 1024 * 1024, int(1.5 * need_bytes) + (2 << 20))))


def _stats_kernel(x_ref, sum_ref, gram_ref, *, true_l, tile_l):
    """Pass 1: accumulate per-batch x row-sums and Gram matrix x @ x^T (f32)."""
    @pl.when(pl.program_id(1) == 0)
    def _init():
        sum_ref[...] = jnp.zeros_like(sum_ref)
        gram_ref[...] = jnp.zeros_like(gram_ref)

    x = x_ref[...]                                          # (C_in, tile_l) f32
    # Mask ragged-tail columns (partial edge block reads are unspecified).
    col = jax.lax.broadcasted_iota(jnp.int32, x.shape, 1) + pl.program_id(1) * tile_l
    x = jnp.where(col < true_l, x, 0.0)

    sum_ref[...] += jnp.sum(x, axis=-1, keepdims=True)
    gram_ref[...] += jax.lax.dot_general(                   # x @ x^T, no transpose copy
        x, x, (((1,), (1,)), ((), ())), preferred_element_type=jnp.float32)


def _apply_kernel(x_ref, w_ref, scale_ref, shift_ref, o_ref, *, compute_dtype):
    """Pass 2: y = W @ x, fused per-channel scale/shift (BN affine) + ReLU."""
    x = x_ref[...].astype(compute_dtype)                    # in-register cast (no HBM cost)
    y = jnp.dot(w_ref[...], x, preferred_element_type=jnp.float32)
    o_ref[...] = jnp.maximum(y * scale_ref[...] + shift_ref[...], 0.0).astype(o_ref.dtype)


def layers_forward(x, w, b, gamma, beta, *,
                   compute_dtype=jnp.bfloat16, out_dtype=None):
    """Conv1d(kernel_size=1) + BatchNorm1d(training-mode) + ReLU.

    x: (N, C_in, L) f32, w: (C_out, C_in), b/gamma/beta: (C_out,).
    Returns (N, C_out, L) in `out_dtype` (default: x.dtype).
    """
    N, C_in, L = x.shape
    C_out = w.shape[0]
    out_dtype = x.dtype if out_dtype is None else out_dtype
    out_itemsize = jnp.dtype(out_dtype).itemsize
    cmp_itemsize = jnp.dtype(compute_dtype).itemsize
    w_f32 = w.astype(jnp.float32)

    # ---- Pass 1: per-batch x sums + Gram (f32, x read directly from HBM) ------
    tile1 = _pick_tile(L, 2 * C_in * 4, _VMEM_BUDGET_STATS, _MAX_TILE_STATS)
    grid1 = (N, pl.cdiv(L, tile1))
    need1 = 2 * C_in * tile1 * 4 + 2 * C_in * (C_in + 1) * 4

    x_spec1 = pl.BlockSpec((pl.Squeezed(), C_in, tile1), lambda n, t: (n, 0, t))
    sum_spec = pl.BlockSpec((pl.Squeezed(), C_in, 1), lambda n, t: (n, 0, 0))
    gram_spec = pl.BlockSpec((pl.Squeezed(), C_in, C_in), lambda n, t: (n, 0, 0))

    part_sum, part_gram = pl.pallas_call(
        functools.partial(_stats_kernel, true_l=L, tile_l=tile1),
        out_shape=(jax.ShapeDtypeStruct((N, C_in, 1), jnp.float32),
                   jax.ShapeDtypeStruct((N, C_in, C_in), jnp.float32)),
        grid_spec=pltpu.PrefetchScalarGridSpec(
            num_scalar_prefetch=0,
            grid=grid1,
            in_specs=[x_spec1],
            out_specs=(sum_spec, gram_spec),
        ),
        compiler_params=pltpu.CompilerParams(
            # N axis is parallel (per-batch partial accumulators -> megacore OK);
            # L-tile axis accumulates -> arbitrary.
            dimension_semantics=("parallel", "arbitrary"),
            vmem_limit_bytes=_vmem_limit(need1),
        ),
    )(x)

    # ---- Fold statistics into one per-channel scale+shift (tiny, plain JAX) ---
    count = jnp.float32(N * L)
    sum_x = jnp.sum(part_sum[:, :, 0], axis=0)              # (C_in,)
    gram = jnp.sum(part_gram, axis=0)                       # (C_in, C_in)
    mean_x = sum_x / count
    mean_wx = w_f32 @ mean_x                                 # E[Wx]  (C_out,)
    e_y2 = jnp.sum((w_f32 @ (gram / count)) * w_f32, axis=1)  # diag(W G W^T)/count
    var = jnp.maximum(e_y2 - mean_wx * mean_wx, 0.0)
    scale = gamma.astype(jnp.float32) * jax.lax.rsqrt(var + BN_EPS)
    # Conv bias `b` is cancelled exactly by training-mode BN mean subtraction.
    shift = beta.astype(jnp.float32) - mean_wx * scale

    # ---- Pass 2: conv recompute + fused affine + ReLU --------------------------
    per_lane2 = 2 * C_in * 4 + 2 * C_out * out_itemsize      # x + out double buffers
    tile2 = _pick_tile(L, per_lane2, _VMEM_BUDGET_APPLY, _MAX_TILE_APPLY)
    grid2 = (N, pl.cdiv(L, tile2))
    need2 = per_lane2 * tile2 + C_out * C_in * cmp_itemsize + 4 * C_out * 4

    x_spec2 = pl.BlockSpec((pl.Squeezed(), C_in, tile2), lambda n, t: (n, 0, t))
    w_spec = pl.BlockSpec((C_out, C_in), lambda n, t: (0, 0))      # VMEM-resident
    vec_spec = pl.BlockSpec((C_out, 1), lambda n, t: (0, 0))       # VMEM-resident
    out_spec = pl.BlockSpec((pl.Squeezed(), C_out, tile2), lambda n, t: (n, 0, t))

    out = pl.pallas_call(
        functools.partial(_apply_kernel, compute_dtype=compute_dtype),
        out_shape=jax.ShapeDtypeStruct((N, C_out, L), out_dtype),
        grid_spec=pltpu.PrefetchScalarGridSpec(
            num_scalar_prefetch=0,
            grid=grid2,
            in_specs=[x_spec2, w_spec, vec_spec, vec_spec],
            out_specs=out_spec,
        ),
        compiler_params=pltpu.CompilerParams(
            dimension_semantics=("parallel", "parallel"),    # v7x megacore
            vmem_limit_bytes=_vmem_limit(need2),
        ),
    )(x, w.astype(compute_dtype), scale.reshape(C_out, 1), shift.reshape(C_out, 1))

    return out


def _reference(x, w, b, gamma, beta):
    """Pure-JAX f32 reference matching PyTorch Conv1d(k=1)+BatchNorm1d(train)+ReLU."""
    y = jnp.einsum("ncl,oc->nol", x, w) + b[None, :, None]
    mean = jnp.mean(y, axis=(0, 2), keepdims=True)
    var = jnp.mean((y - mean) ** 2, axis=(0, 2), keepdims=True)
    y = (y - mean) / jnp.sqrt(var + BN_EPS)
    y = y * gamma[None, :, None] + beta[None, :, None]
    return jnp.maximum(y, 0.0)


if __name__ == "__main__":
    key = jax.random.PRNGKey(0)

    def make_params(k, c_in, c_out):
        kw, kb, kg, kbe = jax.random.split(k, 4)
        w = jax.random.normal(kw, (c_out, c_in), jnp.float32) * 0.1
        b = jax.random.normal(kb, (c_out,), jnp.float32) * 0.1
        gamma = 1.0 + 0.1 * jax.random.normal(kg, (c_out,), jnp.float32)
        beta = 0.1 * jax.random.normal(kbe, (c_out,), jnp.float32)
        return w, b, gamma, beta

    # Case 1: tiny shapes, L < 128 (full-extent lane blocks), exact f32 math path.
    k1, k2, key = jax.random.split(key, 3)
    N, C_in, C_out, L = 2, 4, 8, 16
    x = jax.random.normal(k1, (N, C_in, L), jnp.float32)
    w, b, gamma, beta = make_params(k2, C_in, C_out)
    ref = _reference(x, w, b, gamma, beta)

    out_f32 = jax.block_until_ready(
        layers_forward(x, w, b, gamma, beta, compute_dtype=jnp.float32))
    assert out_f32.shape == (N, C_out, L) and out_f32.dtype == jnp.float32
    assert jnp.allclose(out_f32, ref, atol=1e-3, rtol=1e-3), "case1 f32 mismatch"

    # Bandwidth-optimized path: bf16 MXU inputs + bf16 output store (loose check).
    out_bf16 = jax.block_until_ready(
        layers_forward(x, w, b, gamma, beta,
                       compute_dtype=jnp.bfloat16, out_dtype=jnp.bfloat16))
    assert out_bf16.shape == (N, C_out, L) and out_bf16.dtype == jnp.bfloat16
    assert jnp.allclose(out_bf16.astype(jnp.float32), ref, atol=5e-2, rtol=5e-2), \
        "case1 bf16 mismatch"

    # Case 2: ragged L (>128, not a multiple of 128) exercises masked edge blocks
    # (no wrapper pad and no output slice).
    k3, k4, key = jax.random.split(key, 3)
    N, C_in, C_out, L = 2, 5, 16, 300
    x = jax.random.normal(k3, (N, C_in, L), jnp.float32)
    w, b, gamma, beta = make_params(k4, C_in, C_out)
    ref = _reference(x, w, b, gamma, beta)

    out_rag = jax.block_until_ready(
        layers_forward(x, w, b, gamma, beta, compute_dtype=jnp.float32))
    assert out_rag.shape == (N, C_out, L)
    assert jnp.allclose(out_rag, ref, atol=1e-3, rtol=1e-3), "case2 f32 mismatch"

    print("KERNEL_OK")
</pallas_src>

<mosaic_0001>
module attributes {stable_mosaic.version = 11 : i64} {
  func.func @_stats_kernel(%arg0: i32, %arg1: i32, %arg2: memref<1x4x16xf32, #tpu.memory_space<vmem>>, %arg3: memref<1x4x1xf32, #tpu.memory_space<vmem>>, %arg4: memref<1x4x4xf32, #tpu.memory_space<vmem>>) attributes {dimension_semantics = [#tpu.dimension_semantics<parallel>, #tpu.dimension_semantics<arbitrary>], iteration_bounds = array<i64: 2, 1>, scalar_prefetch = 0 : i64, scratch_operands = 0 : i64, tpu.core_type = #tpu.core_type<tc>, window_params = [{transform_indices = @transform_0, window_bounds = array<i64: 1, 4, 16>}, {transform_indices = @transform_1, window_bounds = array<i64: 1, 4, 1>}, {transform_indices = @transform_2, window_bounds = array<i64: 1, 4, 4>}]} {
    %c0_i32 = arith.constant 0 : i32
    %0 = arith.cmpi eq, %arg1, %c0_i32 : i32
    %1 = arith.extui %0 : i1 to i32
    %c0_i32_0 = arith.constant 0 : i32
    %2 = arith.cmpi ne, %1, %c0_i32_0 : i32
    scf.if %2 {
      %cst_18 = arith.constant 0.000000e+00 : f32
      %28 = vector.broadcast %cst_18 : f32 to vector<4x1xf32>
      %c0_19 = arith.constant 0 : index
      %c0_20 = arith.constant 0 : index
      %c0_21 = arith.constant 0 : index
      %29 = vector.load %arg3[%c0_19, %c0_20, %c0_21] : memref<1x4x1xf32, #tpu.memory_space<vmem>>, vector<1x4x1xf32>
      %30 = vector.shape_cast %29 : vector<1x4x1xf32> to vector<4x1xf32>
      %31 = vector.shape_cast %28 : vector<4x1xf32> to vector<1x4x1xf32>
      tpu.vector_store %arg3[%c0_19, %c0_20, %c0_21], %31 {strides = array<i32>} : memref<1x4x1xf32, #tpu.memory_space<vmem>>, vector<1x4x1xf32>,
      %cst_22 = arith.constant 0.000000e+00 : f32
      %32 = vector.broadcast %cst_22 : f32 to vector<4x4xf32>
      %c0_23 = arith.constant 0 : index
      %c0_24 = arith.constant 0 : index
      %c0_25 = arith.constant 0 : index
      %33 = vector.load %arg4[%c0_23, %c0_24, %c0_25] : memref<1x4x4xf32, #tpu.memory_space<vmem>>, vector<1x4x4xf32>
      %34 = vector.shape_cast %33 : vector<1x4x4xf32> to vector<4x4xf32>
      %35 = vector.shape_cast %32 : vector<4x4xf32> to vector<1x4x4xf32>
      tpu.vector_store %arg4[%c0_23, %c0_24, %c0_25], %35 {strides = array<i32>} : memref<1x4x4xf32, #tpu.memory_space<vmem>>, vector<1x4x4xf32>,
    } else {
    }
    %c0 = arith.constant 0 : index
    %c0_1 = arith.constant 0 : index
    %c0_2 = arith.constant 0 : index
    %3 = vector.load %arg2[%c0, %c0_1, %c0_2] : memref<1x4x16xf32, #tpu.memory_space<vmem>>, vector<1x4x16xf32>
    %4 = vector.shape_cast %3 : vector<1x4x16xf32> to vector<4x16xf32>
    %5 = tpu.iota {dimensions = array<i32: 1>} : vector<4x16xi32>
    %c16_i32 = arith.constant 16 : i32
    %6 = arith.muli %arg1, %c16_i32 : i32
    %7 = vector.broadcast %6 : i32 to vector<4x16xi32>
    %8 = arith.addi %5, %7 : vector<4x16xi32>
    %c16_i32_3 = arith.constant 16 : i32
    %9 = vector.broadcast %c16_i32_3 : i32 to vector<4x16xi32>
    %10 = arith.cmpi slt, %8, %9 : vector<4x16xi32>
    %cst = arith.constant 0.000000e+00 : f32
    %11 = vector.broadcast %cst : f32 to vector<4x16xf32>
    %12 = arith.select %10, %4, %11 : vector<4x16xi1>, vector<4x16xf32>
    %c0_4 = arith.constant 0 : index
    %c0_5 = arith.constant 0 : index
    %c0_6 = arith.constant 0 : index
    %13 = vector.load %arg3[%c0_4, %c0_5, %c0_6] : memref<1x4x1xf32, #tpu.memory_space<vmem>>, vector<1x4x1xf32>
    %14 = vector.shape_cast %13 : vector<1x4x1xf32> to vector<4x1xf32>
    %cst_7 = arith.constant dense<0.000000e+00> : vector<4xf32>
    %15 = vector.multi_reduction <add>, %12, %cst_7 [1] : vector<4x16xf32> to vector<4xf32>
    %16 = vector.shape_cast %15 : vector<4xf32> to vector<4x1xf32>
    %17 = arith.addf %14, %16 : vector<4x1xf32>
    %c0_8 = arith.constant 0 : index
    %c0_9 = arith.constant 0 : index
    %c0_10 = arith.constant 0 : index
    %18 = vector.load %arg3[%c0_8, %c0_9, %c0_10] : memref<1x4x1xf32, #tpu.memory_space<vmem>>, vector<1x4x1xf32>
    %19 = vector.shape_cast %18 : vector<1x4x1xf32> to vector<4x1xf32>
    %20 = vector.shape_cast %17 : vector<4x1xf32> to vector<1x4x1xf32>
    tpu.vector_store %arg3[%c0_8, %c0_9, %c0_10], %20 {strides = array<i32>} : memref<1x4x1xf32, #tpu.memory_space<vmem>>, vector<1x4x1xf32>,
    %c0_11 = arith.constant 0 : index
    %c0_12 = arith.constant 0 : index
    %c0_13 = arith.constant 0 : index
    %21 = vector.load %arg4[%c0_11, %c0_12, %c0_13] : memref<1x4x4xf32, #tpu.memory_space<vmem>>, vector<1x4x4xf32>
    %22 = vector.shape_cast %21 : vector<1x4x4xf32> to vector<4x4xf32>
    %cst_14 = arith.constant dense<0.000000e+00> : vector<4x4xf32>
    %23 = tpu.matmul %12, %12, %cst_14 {dimension_numbers = #tpu.dot_dimension_numbers<[1], [1], [0], [0], [0, 0, 1, 0], [], []>} : vector<4x16xf32>, vector<4x16xf32>, vector<4x4xf32> -> vector<4x4xf32>
    %24 = arith.addf %22, %23 : vector<4x4xf32>
    %c0_15 = arith.constant 0 : index
    %c0_16 = arith.constant 0 : index
    %c0_17 = arith.constant 0 : index
    %25 = vector.load %arg4[%c0_15, %c0_16, %c0_17] : memref<1x4x4xf32, #tpu.memory_space<vmem>>, vector<1x4x4xf32>
    %26 = vector.shape_cast %25 : vector<1x4x4xf32> to vector<4x4xf32>
    %27 = vector.shape_cast %24 : vector<4x4xf32> to vector<1x4x4xf32>
    tpu.vector_store %arg4[%c0_15, %c0_16, %c0_17], %27 {strides = array<i32>} : memref<1x4x4xf32, #tpu.memory_space<vmem>>, vector<1x4x4xf32>,
    return
  }
  func.func @transform_0(%arg0: i32, %arg1: i32) -> (i32, i32, i32) {
    %c0_i32 = arith.constant 0 : i32
    %c0_i32_0 = arith.constant 0 : i32
    return %arg0, %c0_i32, %arg1 : i32, i32, i32
  }
  func.func @transform_1(%arg0: i32, %arg1: i32) -> (i32, i32, i32) {
    %c0_i32 = arith.constant 0 : i32
    %c0_i32_0 = arith.constant 0 : i32
    %c0_i32_1 = arith.constant 0 : i32
    return %arg0, %c0_i32, %c0_i32_0 : i32, i32, i32
  }
  func.func @transform_2(%arg0: i32, %arg1: i32) -> (i32, i32, i32) {
    %c0_i32 = arith.constant 0 : i32
    %c0_i32_0 = arith.constant 0 : i32
    %c0_i32_1 = arith.constant 0 : i32
    return %arg0, %c0_i32, %c0_i32_0 : i32, i32, i32
  }
}

</mosaic_0001>

<bundles_post_ra>
// kernel: tpu_custom_call.1
= control target key start
LH: loop header
LB: loop body
LE: loop exit
PB: predicated region body
PF: predicated region fallthrough
CT: control target
= control target key end

     0   :  { %8 = vsyncpa [#allocation3], 0  ;;  %s774_s0 = inlined_call_operand.hbm [shape: f32[2,4,16], index: 0, kind: input, shape index: {}]   ;;  %s775_s1 = inlined_call_operand.vmem [shape: f32[2,4,1], index: 1, kind: output, shape index: {0}]   ;;  %s776_s2 = inlined_call_operand.hbm [shape: f32[2,4,4], index: 2, kind: output, shape index: {1}]  }
   0x1   :  { %10 = vsyncpa [#allocation3 + $0x1], 0 }
   0x2   :  { %11 = vsyncpa [#allocation4], 0 }
   0x3   :  { %13 = vsyncpa [#allocation4 + $0x1], 0  ;;  %s627_s9 = smov 0   ;;  %s629_s10 = smov 0  }
   0x4   :  { %s631_s11 = smov 0   ;;  %s633_s12 = smov 0  }
   0x5   :  { %s635_s13 = smov 0   ;;  %s637_s14 = smov 0  }
   0x6 LB: > { %s411_s15 = sadd.s32 4294967295, %s606_s14   ;;  %s412_s16 = sadd.s32 4294967294, %s606_s14   ;;  %s606_s14 = sphi %s637_s14, %s19_s14   ;;  %s602_s13 = sphi %s635_s13, %s788_s13   ;;  %s598_s12 = sphi %s633_s12, %s787_s12   ;;  %s594_s11 = sphi %s631_s11, %s786_s11   ;;  %s590_s10 = sphi %s629_s10, %s785_s10   ;;  %s586_s9 = sphi %s627_s9, %s784_s9  }
   0x7   : > { %s31_s17 = sadd.s32 1, %s602_s13  ;;  %s40_s18 = sadd.s32 1, %s594_s11 }
   0x8   : > { %p33_p0 = scmp.ge.s32.totalorder %s31_s17, 2  ;;  %p47_p1 = scmp.ne.s32.totalorder %s594_s11, %s590_s10 }
   0x9   : > { %p48_p2 = scmp.eq.s32.totalorder %s606_s14, 0  ;;  %p53_p3 = scmp.ne.s32.totalorder %s590_s10, %s586_s9 }
   0xa   : > { %s790_s17 = smov (%p33_p0, %s31_s17), 0  ;;  %p54_p5 = scmp.eq.s32.totalorder %s411_s15, 0 }
   0xb   : > { %p668_p4 = por %p48_p2, %p47_p1  ;;  %s35_s20 = ssub.s32 %s602_s13, %s790_s17 }
   0xc   : > { %p103_p6 = scmp.eq.s32.totalorder %s411_s15, 1  ;;  %p38_p7 = scmp.eq.s32.totalorder %s35_s20, 0 }
   0xd   : > { %p674_p8 = por %p54_p5, %p53_p3  ;;  %p109_p10 = scmp.eq.s32.totalorder %s412_s16, 1 }
   0xe   : > { %p678_p9 = por %p103_p6, %p47_p1  ;;  %p446_p13 = scmp.lt.s32.totalorder %s606_s14, 2 }
   0xf   : > { %s683_s23 = scalar_select %p38_p7, %s594_s11, %s40_s18  }
  0x10   : > { %p685_p11 = por %p109_p10, %p53_p3  ;;  %s129_s25 = sand.u32 1, %s594_s11  }
  0x11   : > { %s415_s26 = sshll.u32 %s129_s25, 2  ;;  %s416_s27 = sshll.u32 %s602_s13, 6 }
  0x12   : > { %s780_s24 = scalar_select %p685_p11, 1, 0 }
  0x13   : > { %s139_s30 = scalar_lea.hbm %s774_s0, %s416_s27  ;;  %s133_s3 = scalar_lea.vmem [#allocation2], %s415_s26 }
  0x14   : > { %s141_s4 = sshll.u32 %s133_s3, 4  ;;  %p698_p0 = pnand %p446_p13, %p668_p4  ;;  %s142_s4 = int_to_ptr.vmem [resolvable:$true] %s141_s4 }
  0x15   : > { %p417_p1 = scmp.ge.s32.totalorder %s606_s14, 1  ;;  %p146_p2 = scmp.lt.s32.totalorder %s606_s14, 3 }
  0x16   : > { %s130_s6 = scalar_lea.sflag [#allocation3], %s129_s25  ;;  %p500_p3 = pneg %p698_p0 }
  0x17   : > { %s511_s7 = scalar_lea.vmem %s142_s4, 64  ;;  %s608_s8 = smov [#allocation2]  }
  0x18   : > { %p512_p5 = scmp.ne.s32.totalorder %s142_s4, %s511_s7  ;;  %s516_s15 = sshll.u32 %s608_s8, 4  ;;  %s517_s15 = int_to_ptr.vmem [resolvable:$false] %s516_s15 }
  0x19   : > { %s518_s16 = scalar_lea.vmem %s517_s15, 128  ;;  %p519_p10 = scmp.lt.s32.totalorder %s142_s4, %s517_s15 }
  0x1a   : > { %p514_p6 = pnand %p512_p5, %p500_p3  ;;  %p520_p12 = scmp.lt.s32.totalorder %s518_s16, %s511_s7 }
  0x1c   : > { %p515_p7 = pneg %p514_p6  ;;  %p521_p4 = por %p520_p12, %p519_p10 }
  0x1e   : > { %p522_p13 = pnand %p521_p4, %p515_p7 }
  0x20   : > { %525 = shalt.err (!%p522_p13)
}
  0x21   : > { %441 = dma.hbm_to_vmem [thread:$0]  (!%p698_p0), %s139_s30, 64, %s142_s4, %s130_s6  }
  0x22   : > { %p147_p11 = pnand %p417_p1, %p146_p2 }
  0x23   : > { %s713_s18 = sand.u32 (!%p147_p11), 1, %s590_s10  }
  0x24   : > { %150 = sbr.rel (%p147_p11) target bundleno = 259 (0x103), region = 24  ;;  %s418_s19 = sshll.u32 (!%p147_p11), %s713_s18, 2 }
  0x25   : > { %s153_s20 = scalar_lea.sflag (!%p147_p11), [#allocation3], %s713_s18  ;;  %s156_s25 = scalar_lea.vmem (!%p147_p11), [#allocation2], %s418_s19 }
  0x29   : > { %577 = dma.done.wait (%p674_p8), %s153_s20, 64  }
  0x2a   : > { %579 = vsyncadd (%p674_p8), %s153_s20, 4294967232  ;;  %v194_v0 = vlaneseq  ;;  %v609_v1 = vmov 0.0   ;;  %vm610_vm0 = vmmov 0   ;;  %vm191_vm1 = vcmask 27648   ;;  %s180_s26 = scalar_lea.vmem [#allocation5], %s418_s19  ;;  %p181_p8 = scmp.lt.s32.totalorder %s598_s12, 1 }
  0x2b   : > { %429 = vmatprep.subr.mxu0 %v609_v1  ;;  %431 = vmatprep.mubr.msk.f32.mxu0 %vm610_vm0, %v609_v1  ;;  %192 = vst.msk [vmem:[%s180_s26] sm:$0xf] %vm191_vm1, %v609_v1  ;;  %vm210_vm3 = vcmask 130048   ;;  %vm202_vm4 = vcmask 125952   ;;  %v193_v3 = vld [vmem:[%s156_s25] sm:$0xf] }
  0x2c   : > { %v195_v2 = vand.u32 127, %v194_v0  ;;  %s182_s21 = scalar_select %p181_p8, %s598_s12, 1  ;;  %vm189_vm5 = vcmask 3072  }
  0x2d   : > { %s424_s3 = sshll.u32 %s598_s12, 6  ;;  %s308_s4 = sshll.u32 %s180_s26, 4  ;;  %s309_s4 = int_to_ptr.vmem [resolvable:$true] %s308_s4 }
  0x2e   : > { %vm199_vm2 = vcmp.lt.s32.totalorder %v195_v2, 16  ;;  %s420_s27 = sshll.u32 %s182_s21, 2  ;;  %s731_s7 = scalar_lea.hbm %s776_s2, %s424_s3 }
  0x2f   : > { %v200_v4 = vsel %vm199_vm2, %v193_v3, 0.0  ;;  %s184_s30 = scalar_lea.vmem %s775_s1, %s420_s27  ;;  %s292_s8 = scalar_lea.sflag [#allocation4], %s713_s18 }
  0x30   : > { %430 = vmatpush3.xpose.msk.msra.mxu0 %vm210_vm3, %v200_v4  ;;  %v203_v5 = vsel %vm202_vm4, %v200_v4, 0.0  ;;  %190 = vst.msk [vmem:[%s184_s30] sm:$0xf] %vm189_vm5, %v609_v1  ;;  %s526_s15 = scalar_lea.vmem %s309_s4, 64  ;;  %s611_s16 = smov [#allocation5]  }
  0x31   : > { %204 = vadd.xlane.f32.xlu0 %v203_v5  ;;  %p527_p11 = scmp.ne.s32.totalorder %s309_s4, %s526_s15  ;;  %s530_s12 = sshll.u32 %s611_s16, 4  ;;  %s531_s12 = int_to_ptr.vmem [resolvable:$false] %s530_s12 }
  0x32   : > { %v209_v9 = vld [vmem:[%s180_s26] sm:$0xf]  ;;  %s532_s19 = scalar_lea.vmem %s531_s12, 128  ;;  %p533_p1 = scmp.lt.s32.totalorder %s309_s4, %s531_s12 }
  0x33   : > { %432 = vmatmul.mubr.msk.f32.vlgmr.msra.gmra.mxu0 %vm210_vm3, %v200_v4  ;;  %p528_p12 = pnand %p527_p11, %p678_p9  ;;  %p534_p2 = scmp.lt.s32.totalorder %s532_s19, %s526_s15 }
  0x35   : > { %p529_p0 = pneg %p528_p12  ;;  %p535_p3 = por %p534_p2, %p533_p1 }
  0x37   : > { %v201_v6 = vld [vmem:[%s184_s30] sm:$0xf]  ;;  %p536_p5 = pnand %p535_p3, %p529_p0 }
  0xba   : > { %v205_v7 = vpop.xlane.xlu0 %204 }
  0xbb   : > { %v206_v8 = vadd.f32 %v205_v7, %v201_v6 }
  0xbd   : > { %208 = vst.msk [vmem:[%s184_s30] sm:$0xf] %vm189_vm5, %v206_v8 }
  0xf3   : > { %v280_v10 = vpop.f32.mrf.mxu0 }
  0xf4   : > { %v284_v11 = vadd.f32 %v280_v10, %v209_v9 }
  0xf5   : > { %v433_v12 = vpop.f32.mrf.mxu0 }
  0xf6   : > { %286 = vst.msk [vmem:[%s180_s26] sm:$0xf] %vm191_vm1, %v284_v11 }
  0xf7   : > { %539 = shalt.err (!%p536_p5)
}
  0xf8   : > { %s540_s20 = scalar_lea.hbm %s731_s7, 64  ;;  %s544_s26 = scalar_lea.hbm %s776_s2, 128 }
  0xf9   : > { %p541_p6 = scmp.ne.s32.totalorder %s731_s7, %s540_s20  ;;  %p545_p4 = scmp.lt.s32.totalorder %s731_s7, %s776_s2 }
  0xfa   : > { %p546_p13 = scmp.lt.s32.totalorder %s544_s26, %s540_s20 }
  0xfb   : > { %p542_p7 = pnand %p541_p6, %p678_p9 }
  0xfc   : > { %p547_p8 = por %p546_p13, %p545_p4 }
  0xfd   : > { %p543_p10 = pneg %p542_p7 }
  0xff   : > { %p548_p11 = pnand %p547_p8, %p543_p10 }
 0x101   : > { %551 = shalt.err (!%p548_p11)
}
 0x102   : > { %436 = dma.vmem_to_hbm [thread:$0]  (%p678_p9), %s309_s4, 64, %s731_s7, %s292_s8  }
 0x103 PF: > { %s327_s28 = sand.u32 1, %s586_s9   ;;  %p782_p12 = scmp.ne.s32.totalorder %s780_s24, 0 }
 0x104   : > { %p783_p0 = scmp.ge.s32.totalorder %s606_s14, 2  ;;  %s328_s29 = scalar_lea.sflag [#allocation4], %s327_s28 }
 0x106   : > { %p443_p1 = pnand %p783_p0, %p782_p12 }
 0x108   : > { %p444_p2 = pneg %p443_p1 }
 0x10a   : > { %581 = dma.done.wait (%p444_p2), %s328_s29, 64  }
 0x10b   : > { %583 = vsyncadd (%p444_p2), %s328_s29, 4294967232  ;;  %s19_s14 = sadd.s32 1, %s606_s14   ;;  %s784_s9 = smov %s590_s10 }
 0x10c   : > { %p16_p3 = scmp.ge.s32.totalorder %s19_s14, 4   ;;  %s785_s10 = smov %s594_s11 }
 0x10d   : > { %s786_s11 = smov %s683_s23  ;;  %s787_s12 = smov %s602_s13 }
 0x10e   : > { %s788_s13 = smov %s790_s17  ;;  %18 = sbr.rel (!%p16_p3) target bundleno = 6 (0x6), region = 85 }
 0x113   :  { %333 = vsyncpa [#allocation3], 1 }
 0x114   :  { %335 = vsyncpa [#allocation3 + $0x1], 1 }
 0x115   :  { %336 = vsyncpa [#allocation4], 1 }
 0x116   :  { %338 = vsyncpa [#allocation4 + $0x1], 1 }

</bundles_post_ra>
